<compile_context>
chip_gen: v6e
topology: v6e:2x2x1
jax: 0.10.0
libtpu: 0.0.40
codegen_flags: <defaults>
</compile_context>

<pallas_src>
import functools

import jax
import jax.numpy as jnp
from jax.experimental import pallas as pl
from jax.experimental.pallas import tpu as pltpu


def nerf_kernel(x_ref, w1_ref, wmid_ref, w5_ref, w8_ref, b_ref, out_ref):
    f32, bf16 = jnp.float32, jnp.bfloat16
    b = b_ref[...]                                    # (F, 8) f32, one column per layer

    def lin_relu(h_f32, w_bf16, col):
        # Lane-major layer: (F_out, K)bf16 @ (K, TB)bf16 on the MXU with f32
        # accumulation; bias add + ReLU in f32 on the VPU.
        y = (jnp.dot(w_bf16, h_f32.astype(bf16), preferred_element_type=f32)
             + b[:, col:col + 1])
        return jnp.maximum(y, 0.0)

    # Layer 1 (x is already bf16).
    h1 = jnp.maximum(
        jnp.dot(w1_ref[...], x_ref[...], preferred_element_type=f32) + b[:, 0:1], 0.0)
    h2 = lin_relu(h1, wmid_ref[0], 1)
    h3 = lin_relu(h2, wmid_ref[1], 2)                 # post-activation of layer 3
    h4 = lin_relu(h3, wmid_ref[2], 3)                 # post-activation of layer 4

    # Layer 5 skip: [h4; h3] stacked along sublanes -> single K=2F matmul.
    h43 = jnp.concatenate([h4, h3], axis=0)           # (2F, TB) f32
    h5 = lin_relu(h43, w5_ref[...], 4)

    h6 = lin_relu(h5, wmid_ref[3], 5)
    h7 = lin_relu(h6, wmid_ref[4], 6)

    # Layer 8 (no ReLU inside the Sequential); weight rows 4..7 are zero pad.
    out8 = (jnp.dot(w8_ref[...], h7.astype(bf16), preferred_element_type=f32)
            + b[0:8, 7:8])                            # (8, TB) f32

    # Heads: rows 0..2 sigmoid (rgb), row 3 ReLU (sigma); rows 4..7 padding.
    row = jax.lax.broadcasted_iota(jnp.int32, out8.shape, 0)
    out_ref[...] = jnp.where(row < 3, jax.nn.sigmoid(out8), jnp.maximum(out8, 0.0))


def _pack_params(params):
    """Transpose + pack PyTorch-layout params for the lane-major kernel."""
    bf16, f32 = jnp.bfloat16, jnp.float32
    F = params["w1"].shape[1]
    w1t = params["w1"].T.astype(bf16)                                   # (F, C)
    wmid = jnp.stack([params["w2"].T, params["w3"].T, params["w4"].T,
                      params["w6"].T, params["w7"].T]).astype(bf16)      # (5, F, F)
    # w5 is (2F, F); rows 0..F-1 multiply h4, rows F..2F-1 multiply h3, which
    # matches the [h4; h3] sublane stack used in the kernel.
    w5t = params["w5"].T.astype(bf16)                                   # (F, 2F)
    w8t = jnp.zeros((8, F), f32).at[:4, :].set(params["w8"].T).astype(bf16)
    bias = jnp.zeros((F, 8), f32)
    for j, name in enumerate(("b1", "b2", "b3", "b4", "b5", "b6", "b7")):
        bias = bias.at[:, j].set(params[name].reshape(-1))
    bias = bias.at[:4, 7].set(params["b8"].reshape(-1))
    return w1t, wmid, w5t, w8t, bias


@functools.partial(jax.jit, static_argnames=("tile_b",))
def nerf_forward(x, params, tile_b: int = 2048):
    B, C = x.shape
    F = params["w1"].shape[1]
    assert F % 8 == 0, "filter_size must be a multiple of 8 (sublane constraint)"

    # Effective batch tile: multiple of 128 (lane axis), capped so the grid
    # has >= 4 steps when the batch allows (>= 2 per v7x TensorCore for
    # prefetch/writeback overlap), but never below one lane tile.
    want = max(128, -(-(-(-B // 4)) // 128) * 128)    # ceil(ceil(B/4) / 128) * 128
    tile = max(128, min(tile_b, want))
    Bp = -(-B // tile) * tile
    grid = (Bp // tile,)

    # Lane-major input: (C, Bp) bf16; padded columns are sliced off afterwards.
    xt = x.astype(jnp.bfloat16).T
    if Bp != B:
        xt = jnp.pad(xt, ((0, 0), (0, Bp - B)))

    weight_args = _pack_params(params)                # 5 resident parameter slabs

    def resident(p):  # full array, same block every grid step -> stays in VMEM
        return pl.BlockSpec(p.shape, lambda i, _n=p.ndim: (0,) * _n)

    in_specs = ([pl.BlockSpec((C, tile), lambda i: (0, i))]
                + [resident(p) for p in weight_args])
    out_specs = pl.BlockSpec((8, tile), lambda i: (0, i))

    flops_per_col = 2 * (F * C + 5 * F * F + 2 * F * F + 8 * F)
    bytes_accessed = (int(xt.size) * 2 + 8 * Bp * 4
                      + sum(int(p.size) * p.dtype.itemsize for p in weight_args))
    cost = pl.CostEstimate(flops=int(flops_per_col * Bp),
                           transcendentals=int(8 * Bp),
                           bytes_accessed=int(bytes_accessed))

    y = pl.pallas_call(
        nerf_kernel,
        out_shape=jax.ShapeDtypeStruct((8, Bp), jnp.float32),
        grid=grid,
        in_specs=in_specs,
        out_specs=out_specs,
        compiler_params=pltpu.CompilerParams(
            dimension_semantics=("parallel",),
            vmem_limit_bytes=16 * 1024 * 1024),
        cost_estimate=cost,
    )(xt, *weight_args)

    rgb = y[:3, :B].T                                  # (B, 3)
    sigma = y[3, :B]                                   # (B,)
    return rgb, sigma


def init_params(key, in_channels: int, filter_size: int):
    """Deterministic init mimicking PyTorch nn.Linear default U(-k, k), k=1/sqrt(fan_in)."""
    F = filter_size
    specs = [("1", in_channels, F), ("2", F, F), ("3", F, F), ("4", F, F),
             ("5", 2 * F, F), ("6", F, F), ("7", F, F), ("8", F, 4)]
    params = {}
    keys = jax.random.split(key, 2 * len(specs))
    for idx, (name, fan_in, fan_out) in enumerate(specs):
        bound = 1.0 / float(fan_in) ** 0.5
        params["w" + name] = jax.random.uniform(
            keys[2 * idx], (fan_in, fan_out), jnp.float32, -bound, bound)
        params["b" + name] = jax.random.uniform(
            keys[2 * idx + 1], (1, fan_out), jnp.float32, -bound, bound)
    return params


def nerf_forward_ref(x, params):
    """Pure-JAX f32 reference for correctness check."""
    relu = lambda v: jnp.maximum(v, 0.0)
    h = relu(x @ params["w1"] + params["b1"])
    h = relu(h @ params["w2"] + params["b2"])
    h3 = relu(h @ params["w3"] + params["b3"])
    h4 = relu(h3 @ params["w4"] + params["b4"])
    cat = jnp.concatenate([h4, h3], axis=-1)
    h = relu(cat @ params["w5"] + params["b5"])
    h = relu(h @ params["w6"] + params["b6"])
    h = relu(h @ params["w7"] + params["b7"])
    out = h @ params["w8"] + params["b8"]
    return jax.nn.sigmoid(out[:, :3]), jnp.maximum(out[:, 3], 0.0)


if __name__ == "__main__":
    batch = 1024          # -> tile 256, 4 grid steps (>= 2 per v7x TensorCore)
    in_channels = 16
    filter_size = 32

    key = jax.random.PRNGKey(0)
    kx, kp = jax.random.split(key)
    x = jax.random.normal(kx, (batch, in_channels), dtype=jnp.float32)
    params = init_params(kp, in_channels, filter_size)

    rgb, sigma = nerf_forward(x, params)
    jax.block_until_ready((rgb, sigma))

    rgb_ref, sigma_ref = nerf_forward_ref(x, params)
    assert rgb.shape == (batch, 3)
    assert sigma.shape == (batch,)
    # bf16 MXU operands with f32 accumulation -> looser tolerance vs pure-f32
    # reference (observed error << 1e-2 for this net).
    assert jnp.allclose(rgb, rgb_ref, atol=2e-2, rtol=2e-2)
    assert jnp.allclose(sigma, sigma_ref, atol=2e-2, rtol=2e-2)

    print("KERNEL_OK")
</pallas_src>

<mosaic_0001>
module attributes {stable_mosaic.version = 11 : i64} {
  func.func @nerf_kernel(%arg0: i32, %arg1: memref<16x256xbf16, #tpu.memory_space<vmem>>, %arg2: memref<32x16xbf16, #tpu.memory_space<vmem>>, %arg3: memref<5x32x32xbf16, #tpu.memory_space<vmem>>, %arg4: memref<32x64xbf16, #tpu.memory_space<vmem>>, %arg5: memref<8x32xbf16, #tpu.memory_space<vmem>>, %arg6: memref<32x8xf32, #tpu.memory_space<vmem>>, %arg7: memref<8x256xf32, #tpu.memory_space<vmem>>) attributes {dimension_semantics = [#tpu.dimension_semantics<parallel>], iteration_bounds = array<i64: 4>, scalar_prefetch = 0 : i64, scratch_operands = 0 : i64, tpu.core_type = #tpu.core_type<tc>, window_params = [{transform_indices = @transform_0, window_bounds = array<i64: 16, 256>}, {pipeline_mode = #tpu.pipeline_mode<synchronous>, transform_indices = @transform_1, window_bounds = array<i64: 32, 16>}, {pipeline_mode = #tpu.pipeline_mode<synchronous>, transform_indices = @transform_2, window_bounds = array<i64: 5, 32, 32>}, {pipeline_mode = #tpu.pipeline_mode<synchronous>, transform_indices = @transform_3, window_bounds = array<i64: 32, 64>}, {pipeline_mode = #tpu.pipeline_mode<synchronous>, transform_indices = @transform_4, window_bounds = array<i64: 8, 32>}, {pipeline_mode = #tpu.pipeline_mode<synchronous>, transform_indices = @transform_5, window_bounds = array<i64: 32, 8>}, {transform_indices = @transform_6, window_bounds = array<i64: 8, 256>}]} {
    %c0 = arith.constant 0 : index
    %c0_0 = arith.constant 0 : index
    %0 = vector.load %arg6[%c0, %c0_0] : memref<32x8xf32, #tpu.memory_space<vmem>>, vector<32x8xf32>
    %c0_1 = arith.constant 0 : index
    %c0_2 = arith.constant 0 : index
    %1 = vector.load %arg2[%c0_1, %c0_2] : memref<32x16xbf16, #tpu.memory_space<vmem>>, vector<32x16xbf16>
    %c0_3 = arith.constant 0 : index
    %c0_4 = arith.constant 0 : index
    %2 = vector.load %arg1[%c0_3, %c0_4] : memref<16x256xbf16, #tpu.memory_space<vmem>>, vector<16x256xbf16>
    %cst = arith.constant dense<0.000000e+00> : vector<32x256xf32>
    %3 = tpu.matmul %1, %2, %cst {dimension_numbers = #tpu.dot_dimension_numbers<[1], [0], [0], [1], [0, 0, 1, 1], [], []>} : vector<32x16xbf16>, vector<16x256xbf16>, vector<32x256xf32> -> vector<32x256xf32>
    %4 = vector.extract_strided_slice %0 {offsets = [0, 0], sizes = [32, 1], strides = [1, 1]} : vector<32x8xf32> to vector<32x1xf32>
    %5 = vector.broadcast %4 : vector<32x1xf32> to vector<32x256xf32>
    %6 = arith.addf %3, %5 : vector<32x256xf32>
    %cst_5 = arith.constant 0.000000e+00 : f32
    %7 = vector.broadcast %cst_5 : f32 to vector<32x256xf32>
    %8 = arith.maximumf %6, %7 : vector<32x256xf32>
    %c0_6 = arith.constant 0 : index
    %c0_7 = arith.constant 0 : index
    %c0_8 = arith.constant 0 : index
    %9 = vector.load %arg3[%c0_6, %c0_7, %c0_8] : memref<5x32x32xbf16, #tpu.memory_space<vmem>>, vector<1x32x32xbf16>
    %10 = vector.shape_cast %9 : vector<1x32x32xbf16> to vector<32x32xbf16>
    %11 = arith.truncf %8 : vector<32x256xf32> to vector<32x256xbf16>
    %cst_9 = arith.constant dense<0.000000e+00> : vector<32x256xf32>
    %12 = tpu.matmul %10, %11, %cst_9 {dimension_numbers = #tpu.dot_dimension_numbers<[1], [0], [0], [1], [0, 0, 1, 1], [], []>} : vector<32x32xbf16>, vector<32x256xbf16>, vector<32x256xf32> -> vector<32x256xf32>
    %13 = vector.extract_strided_slice %0 {offsets = [0, 1], sizes = [32, 1], strides = [1, 1]} : vector<32x8xf32> to vector<32x1xf32>
    %14 = vector.broadcast %13 : vector<32x1xf32> to vector<32x256xf32>
    %15 = arith.addf %12, %14 : vector<32x256xf32>
    %cst_10 = arith.constant 0.000000e+00 : f32
    %16 = vector.broadcast %cst_10 : f32 to vector<32x256xf32>
    %17 = arith.maximumf %15, %16 : vector<32x256xf32>
    %c1 = arith.constant 1 : index
    %c0_11 = arith.constant 0 : index
    %c0_12 = arith.constant 0 : index
    %18 = vector.load %arg3[%c1, %c0_11, %c0_12] : memref<5x32x32xbf16, #tpu.memory_space<vmem>>, vector<1x32x32xbf16>
    %19 = vector.shape_cast %18 : vector<1x32x32xbf16> to vector<32x32xbf16>
    %20 = arith.truncf %17 : vector<32x256xf32> to vector<32x256xbf16>
    %cst_13 = arith.constant dense<0.000000e+00> : vector<32x256xf32>
    %21 = tpu.matmul %19, %20, %cst_13 {dimension_numbers = #tpu.dot_dimension_numbers<[1], [0], [0], [1], [0, 0, 1, 1], [], []>} : vector<32x32xbf16>, vector<32x256xbf16>, vector<32x256xf32> -> vector<32x256xf32>
    %22 = vector.extract_strided_slice %0 {offsets = [0, 2], sizes = [32, 1], strides = [1, 1]} : vector<32x8xf32> to vector<32x1xf32>
    %23 = vector.broadcast %22 : vector<32x1xf32> to vector<32x256xf32>
    %24 = arith.addf %21, %23 : vector<32x256xf32>
    %cst_14 = arith.constant 0.000000e+00 : f32
    %25 = vector.broadcast %cst_14 : f32 to vector<32x256xf32>
    %26 = arith.maximumf %24, %25 : vector<32x256xf32>
    %c2 = arith.constant 2 : index
    %c0_15 = arith.constant 0 : index
    %c0_16 = arith.constant 0 : index
    %27 = vector.load %arg3[%c2, %c0_15, %c0_16] : memref<5x32x32xbf16, #tpu.memory_space<vmem>>, vector<1x32x32xbf16>
    %28 = vector.shape_cast %27 : vector<1x32x32xbf16> to vector<32x32xbf16>
    %29 = arith.truncf %26 : vector<32x256xf32> to vector<32x256xbf16>
    %cst_17 = arith.constant dense<0.000000e+00> : vector<32x256xf32>
    %30 = tpu.matmul %28, %29, %cst_17 {dimension_numbers = #tpu.dot_dimension_numbers<[1], [0], [0], [1], [0, 0, 1, 1], [], []>} : vector<32x32xbf16>, vector<32x256xbf16>, vector<32x256xf32> -> vector<32x256xf32>
    %31 = vector.extract_strided_slice %0 {offsets = [0, 3], sizes = [32, 1], strides = [1, 1]} : vector<32x8xf32> to vector<32x1xf32>
    %32 = vector.broadcast %31 : vector<32x1xf32> to vector<32x256xf32>
    %33 = arith.addf %30, %32 : vector<32x256xf32>
    %cst_18 = arith.constant 0.000000e+00 : f32
    %34 = vector.broadcast %cst_18 : f32 to vector<32x256xf32>
    %35 = arith.maximumf %33, %34 : vector<32x256xf32>
    %36 = tpu.concatenate %35, %26 in 0 : vector<32x256xf32>, vector<32x256xf32> -> vector<64x256xf32>
    %c0_19 = arith.constant 0 : index
    %c0_20 = arith.constant 0 : index
    %37 = vector.load %arg4[%c0_19, %c0_20] : memref<32x64xbf16, #tpu.memory_space<vmem>>, vector<32x64xbf16>
    %38 = arith.truncf %36 : vector<64x256xf32> to vector<64x256xbf16>
    %cst_21 = arith.constant dense<0.000000e+00> : vector<32x256xf32>
    %39 = tpu.matmul %37, %38, %cst_21 {dimension_numbers = #tpu.dot_dimension_numbers<[1], [0], [0], [1], [0, 0, 1, 1], [], []>} : vector<32x64xbf16>, vector<64x256xbf16>, vector<32x256xf32> -> vector<32x256xf32>
    %40 = vector.extract_strided_slice %0 {offsets = [0, 4], sizes = [32, 1], strides = [1, 1]} : vector<32x8xf32> to vector<32x1xf32>
    %41 = vector.broadcast %40 : vector<32x1xf32> to vector<32x256xf32>
    %42 = arith.addf %39, %41 : vector<32x256xf32>
    %cst_22 = arith.constant 0.000000e+00 : f32
    %43 = vector.broadcast %cst_22 : f32 to vector<32x256xf32>
    %44 = arith.maximumf %42, %43 : vector<32x256xf32>
    %c3 = arith.constant 3 : index
    %c0_23 = arith.constant 0 : index
    %c0_24 = arith.constant 0 : index
    %45 = vector.load %arg3[%c3, %c0_23, %c0_24] : memref<5x32x32xbf16, #tpu.memory_space<vmem>>, vector<1x32x32xbf16>
    %46 = vector.shape_cast %45 : vector<1x32x32xbf16> to vector<32x32xbf16>
    %47 = arith.truncf %44 : vector<32x256xf32> to vector<32x256xbf16>
    %cst_25 = arith.constant dense<0.000000e+00> : vector<32x256xf32>
    %48 = tpu.matmul %46, %47, %cst_25 {dimension_numbers = #tpu.dot_dimension_numbers<[1], [0], [0], [1], [0, 0, 1, 1], [], []>} : vector<32x32xbf16>, vector<32x256xbf16>, vector<32x256xf32> -> vector<32x256xf32>
    %49 = vector.extract_strided_slice %0 {offsets = [0, 5], sizes = [32, 1], strides = [1, 1]} : vector<32x8xf32> to vector<32x1xf32>
    %50 = vector.broadcast %49 : vector<32x1xf32> to vector<32x256xf32>
    %51 = arith.addf %48, %50 : vector<32x256xf32>
    %cst_26 = arith.constant 0.000000e+00 : f32
    %52 = vector.broadcast %cst_26 : f32 to vector<32x256xf32>
    %53 = arith.maximumf %51, %52 : vector<32x256xf32>
    %c4 = arith.constant 4 : index
    %c0_27 = arith.constant 0 : index
    %c0_28 = arith.constant 0 : index
    %54 = vector.load %arg3[%c4, %c0_27, %c0_28] : memref<5x32x32xbf16, #tpu.memory_space<vmem>>, vector<1x32x32xbf16>
    %55 = vector.shape_cast %54 : vector<1x32x32xbf16> to vector<32x32xbf16>
    %56 = arith.truncf %53 : vector<32x256xf32> to vector<32x256xbf16>
    %cst_29 = arith.constant dense<0.000000e+00> : vector<32x256xf32>
    %57 = tpu.matmul %55, %56, %cst_29 {dimension_numbers = #tpu.dot_dimension_numbers<[1], [0], [0], [1], [0, 0, 1, 1], [], []>} : vector<32x32xbf16>, vector<32x256xbf16>, vector<32x256xf32> -> vector<32x256xf32>
    %58 = vector.extract_strided_slice %0 {offsets = [0, 6], sizes = [32, 1], strides = [1, 1]} : vector<32x8xf32> to vector<32x1xf32>
    %59 = vector.broadcast %58 : vector<32x1xf32> to vector<32x256xf32>
    %60 = arith.addf %57, %59 : vector<32x256xf32>
    %cst_30 = arith.constant 0.000000e+00 : f32
    %61 = vector.broadcast %cst_30 : f32 to vector<32x256xf32>
    %62 = arith.maximumf %60, %61 : vector<32x256xf32>
    %c0_31 = arith.constant 0 : index
    %c0_32 = arith.constant 0 : index
    %63 = vector.load %arg5[%c0_31, %c0_32] : memref<8x32xbf16, #tpu.memory_space<vmem>>, vector<8x32xbf16>
    %64 = arith.truncf %62 : vector<32x256xf32> to vector<32x256xbf16>
    %cst_33 = arith.constant dense<0.000000e+00> : vector<8x256xf32>
    %65 = tpu.matmul %63, %64, %cst_33 {dimension_numbers = #tpu.dot_dimension_numbers<[1], [0], [0], [1], [0, 0, 1, 1], [], []>} : vector<8x32xbf16>, vector<32x256xbf16>, vector<8x256xf32> -> vector<8x256xf32>
    %66 = vector.extract_strided_slice %0 {offsets = [0, 7], sizes = [8, 1], strides = [1, 1]} : vector<32x8xf32> to vector<8x1xf32>
    %67 = vector.broadcast %66 : vector<8x1xf32> to vector<8x256xf32>
    %68 = arith.addf %65, %67 : vector<8x256xf32>
    %69 = tpu.iota {dimensions = array<i32: 0>} : vector<8x256xi32>
    %c3_i32 = arith.constant 3 : i32
    %70 = vector.broadcast %c3_i32 : i32 to vector<8x256xi32>
    %71 = arith.cmpi slt, %69, %70 : vector<8x256xi32>
    %72 = arith.negf %68 : vector<8x256xf32>
    %73 = math.exp %72 : vector<8x256xf32>
    %cst_34 = arith.constant 1.000000e+00 : f32
    %74 = vector.broadcast %cst_34 : f32 to vector<8x256xf32>
    %75 = arith.addf %74, %73 : vector<8x256xf32>
    %76 = arith.divf %74, %75 : vector<8x256xf32>
    %cst_35 = arith.constant 0.000000e+00 : f32
    %77 = vector.broadcast %cst_35 : f32 to vector<8x256xf32>
    %78 = arith.maximumf %68, %77 : vector<8x256xf32>
    %79 = arith.select %71, %76, %78 : vector<8x256xi1>, vector<8x256xf32>
    %c0_36 = arith.constant 0 : index
    %c0_37 = arith.constant 0 : index
    %80 = vector.load %arg7[%c0_36, %c0_37] : memref<8x256xf32, #tpu.memory_space<vmem>>, vector<8x256xf32>
    tpu.vector_store %arg7[%c0_36, %c0_37], %79 {strides = array<i32>} : memref<8x256xf32, #tpu.memory_space<vmem>>, vector<8x256xf32>,
    return
  }
  func.func @transform_0(%arg0: i32) -> (i32, i32) {
    %c0_i32 = arith.constant 0 : i32
    %c0_i32_0 = arith.constant 0 : i32
    return %c0_i32, %arg0 : i32, i32
  }
  func.func @transform_1(%arg0: i32) -> (i32, i32) {
    %c0_i32 = arith.constant 0 : i32
    %c0_i32_0 = arith.constant 0 : i32
    %c0_i32_1 = arith.constant 0 : i32
    return %c0_i32, %c0_i32_0 : i32, i32
  }
  func.func @transform_2(%arg0: i32) -> (i32, i32, i32) {
    %c0_i32 = arith.constant 0 : i32
    %c0_i32_0 = arith.constant 0 : i32
    %c0_i32_1 = arith.constant 0 : i32
    %c0_i32_2 = arith.constant 0 : i32
    return %c0_i32, %c0_i32_0, %c0_i32_1 : i32, i32, i32
  }
  func.func @transform_3(%arg0: i32) -> (i32, i32) {
    %c0_i32 = arith.constant 0 : i32
    %c0_i32_0 = arith.constant 0 : i32
    %c0_i32_1 = arith.constant 0 : i32
    return %c0_i32, %c0_i32_0 : i32, i32
  }
  func.func @transform_4(%arg0: i32) -> (i32, i32) {
    %c0_i32 = arith.constant 0 : i32
    %c0_i32_0 = arith.constant 0 : i32
    %c0_i32_1 = arith.constant 0 : i32
    return %c0_i32, %c0_i32_0 : i32, i32
  }
  func.func @transform_5(%arg0: i32) -> (i32, i32) {
    %c0_i32 = arith.constant 0 : i32
    %c0_i32_0 = arith.constant 0 : i32
    %c0_i32_1 = arith.constant 0 : i32
    return %c0_i32, %c0_i32_0 : i32, i32
  }
  func.func @transform_6(%arg0: i32) -> (i32, i32) {
    %c0_i32 = arith.constant 0 : i32
    %c0_i32_0 = arith.constant 0 : i32
    return %c0_i32, %arg0 : i32, i32
  }
}

</mosaic_0001>

<bundles_post_ra>
// kernel: nerf_forward.1
= control target key start
LH: loop header
LB: loop body
LE: loop exit
PB: predicated region body
PF: predicated region fallthrough
CT: control target
= control target key end

     0   :  { %s1363_s21 = smov 0   ;;  %s1365_s22 = smov 0   ;;  %s1537_s0 = inlined_call_operand.vmem [shape: bf16[16,1024], index: 0, kind: input, shape index: {}]   ;;  %s1538_s1 = inlined_call_operand.vmem [shape: bf16[32,16], index: 1, kind: input, shape index: {}]   ;;  %s1539_s2 = inlined_call_operand.vmem [shape: bf16[5,32,32], index: 2, kind: input, shape index: {}]   ;;  %s1540_s3 = inlined_call_operand.vmem [shape: bf16[32,64], index: 3, kind: input, shape index: {}]   ;;  %s1541_s4 = inlined_call_operand.vmem [shape: bf16[8,32], index: 4, kind: input, shape index: {}]   ;;  %s1542_s5 = inlined_call_operand.vmem [shape: f32[32,8], index: 5, kind: input, shape index: {}]   ;;  %s1543_s6 = inlined_call_operand.vmem [shape: f32[8,1024], index: 6, kind: output, shape index: {}]  }
   0x1   :  { %s1367_s23 = smov 0  }
   0x2 LB: > { %s1161_s24 = sadd.s32 4294967295, %s1318_s23   ;;  %s1380_s25 = sadd.s32 1, %s1318_s23   ;;  %s1318_s23 = sphi %s1367_s23, %s1546_s23   ;;  %s1314_s22 = sphi %s1365_s22, %s1545_s22   ;;  %s1310_s21 = sphi %s1363_s21, %s1544_s21  }
   0x3   : > { %s20_s26 = ssub.s32 %s1318_s23, %s1380_s25  ;;  %s23_s27 = sadd.s32 1, %s1314_s22 }
   0x4   : > { %p21_p0 = scmp.eq.s32.totalorder %s20_s26, 0  ;;  %p30_p1 = scmp.ne.s32.totalorder %s1314_s22, %s1310_s21 }
   0x5   : > { %p31_p2 = scmp.eq.s32.totalorder %s1318_s23, 0  ;;  %p1164_p4 = scmp.ge.s32.totalorder %s1318_s23, 4 }
   0x6   : > { %s1389_s28 = scalar_select %p21_p0, %s1314_s22, %s23_s27  }
   0x7   : > { %p32_p3 = por %p31_p2, %p30_p1  ;;  %202 = sbr.rel (%p1164_p4) target bundleno = 18 (0x12), region = 36 }
   0xc   : > { %205 = sbr.rel (!%p32_p3) target bundleno = 18 (0x12), region = 40  ;;  %s207_s29 = sand.u32 (%p32_p3), 1, %s1314_s22  }
   0xd   : > { %s1223_s30 = sshll.u32 (%p32_p3), %s1318_s23, 3  ;;  %s1165_s7 = sshll.u32 (%p32_p3), %s207_s29, 4 }
   0xe   : > { %s212_s10 = scalar_lea.vmem (%p32_p3), %s1537_s0, %s1223_s30  ;;  %s209_s11 = scalar_lea.vmem (%p32_p3), [#allocation2], %s1165_s7 }
   0xf   : > { %v243_v0 = vld [vmem:[%s212_s10] sm:$0xff] (%p32_p3) }
  0x10   : > { %v245_v1 = vld [vmem:[%s212_s10 + $0x20] sm:$0xff] (%p32_p3)  ;;  %244 = vst [vmem:[%s209_s11] sm:$0xff] (%p32_p3), %v243_v0 }
  0x11   : > { %246 = vst [vmem:[%s209_s11 + $0x8] sm:$0xff] %v245_v1 }
  0x12 PF: > { %p1168_p5 = scmp.ge.s32.totalorder %s1318_s23, 1  ;;  %p251_p6 = scmp.lt.s32.totalorder %s1318_s23, 5 }
  0x14   : > { %p252_p7 = pnand %p1168_p5, %p251_p6 }
  0x15   : > { %s258_s12 = sand.u32 (!%p252_p7), 1, %s1310_s21   ;;  %s1170_s15 = sshll.u32 (!%p252_p7), %s1161_s24, 1 }
  0x16   : > { %255 = sbr.rel (%p252_p7) target bundleno = 1812 (0x714), region = 78  ;;  %s1169_s13 = sshll.u32 (!%p252_p7), %s258_s12, 4 }
  0x17   : > { %s260_s18 = scalar_lea.vmem (!%p252_p7), [#allocation2], %s1169_s13  ;;  %p289_p8 = scmp.lt.s32.totalorder (!%p252_p7), %s1170_s15, 7 }
  0x1b   : > { %v1320_v2 = vmov 0   ;;  %v1405_v3 = vld [vmem:[%s1542_s5] sm:$0xff]  ;;  %v1410_v4 = vld [vmem:[%s1542_s5 + $0x8] sm:$0xff]  ;;  %vm345_vm0 = vcmask 130048   ;;  %v1421_v8 = vld [vmem:[%s1542_s5 + $0x10] sm:$0xff]  ;;  %v1321_v11 = vmov 1  }
  0x1c   : > { %384 = vmatprep.mubr.bf16.mxu0 %v1320_v2  ;;  %1257 = vset.pattern.permute.xlu1 %v1320_v2  ;;  %v1271_v5 = vld [vmem:[%s260_s18 + $0x4] ss:$8 sps:$4 sm:$0xff]   ;;  %v1273_v7 = vld [vmem:[%s260_s18] ss:$8 sps:$4 sm:$0xff]   ;;  %vm447_vm1 = vcmask 261120   ;;  %v1322_v46 = vmov 2  }
  0x1d   : > { %1256 = vset.pattern.permute.xlu0 %v1320_v2  ;;  %486 = vmatprep.mubr.bf16.mxu1 %v1320_v2  ;;  %v1274_v6 = vld [vmem:[%s1538_s1] sm:$0xff]   ;;  %v1426_v9 = vld [vmem:[%s1542_s5 + $0x18] sm:$0xff]  ;;  %v1275_v10 = vld [vmem:[%s1538_s1 + $0x8] sm:$0xff]   ;;  %vm753_vm2 = vcmask 523264   ;;  %s1548_s15 = smov (!%p289_p8, %s1170_s15), 7 }
  0x1e   : > { %307 = vperm.xlu1 %1257, %v1405_v3   ;;  %366 = vmatprep.subr.bf16.mxu0 %v1271_v5  ;;  %v1276_v44 = vld [vmem:[%s1539_s2] sm:$0xff]   ;;  %v1277_v45 = vld [vmem:[%s1539_s2 + $0x8] sm:$0xff]   ;;  %s1171_s16 = sshll.u32 %s1548_s15, 3 }
  0x1f   : > { %317 = vperm.xlu0 %1256, %v1421_v8   ;;  %367 = vmatpush1.bf16.msra.mxu0 %v1273_v7  ;;  %s292_s19 = scalar_lea.vmem %s1543_s6, %s1171_s16 }
  0x22   : > { %312 = vperm.xlu1 %1257, %v1410_v4   ;;  %1176 = vmatmul.mubr.msk.bf16.vlgmr.msra.gmra.mxu0 %vm345_vm0, %v1274_v6 }
  0x23   : > { %322 = vperm.xlu0 %1256, %v1426_v9   ;;  %394 = vmatprep.mubr.bf16.mxu0 %v1320_v2 }
  0x26   : > { %1259 = vset.pattern.permute.xlu1 %v1321_v11 }
  0x27   : > { %1258 = vset.pattern.permute.xlu0 %v1321_v11  ;;  %434 = vperm.xlu1 %1259, %v1426_v9  }
  0x28   : > { %430 = vperm.xlu0 %1258, %v1421_v8  }
  0x2a   : > { %1177 = vmatmul.mubr.msk.bf16.gmra.mxu0 %vm345_vm0, %v1275_v10 }
  0x2b   : > { %588 = vmatprep.mubr.bf16.mxu0 %v1320_v2  ;;  %422 = vperm.xlu1 %1259, %v1405_v3  }
  0x2c   : > { %426 = vperm.xlu0 %1258, %v1410_v4  }
  0x2f   : > { %1260 = vset.pattern.permute.xlu1 %v1322_v46 }
  0x30   : > { %1261 = vset.pattern.permute.xlu0 %v1322_v46  ;;  %533 = vperm.xlu1 %1260, %v1421_v8  }
  0x31   : > { %537 = vperm.xlu0 %1261, %v1426_v9  }
  0x34   : > { %525 = vperm.xlu1 %1260, %v1405_v3  }
  0x38   : > { %529 = vperm.xlu1 %1260, %v1410_v4  }
  0x99   : > { %v308_v15 = vpop.permute.xlu1 %307 }
  0x9a   : > { %v318_v16 = vpop.permute.xlu0 %317 }
  0x9d   : > { %v313_v20 = vpop.permute.xlu1 %312 }
  0x9e   : > { %v323_v21 = vpop.permute.xlu0 %322 }
  0xa2   : > { %v435_v52 = vpop.permute.xlu1 %434 }
  0xa3   : > { %v431_v50 = vpop.permute.xlu0 %430 }
  0xa6   : > { %v423_v60 = vpop.permute.xlu1 %422 }
  0xa7   : > { %v427_v55 = vpop.permute.xlu0 %426 }
  0xe2   : > { %v386_v12 = vpop.f32.mrf.mxu0 }
  0xe3   : > { %v387_v35 = vadd.f32 %v386_v12, %v308_v15 }
  0xe4   : > { %v388_v13 = vpop.f32.mrf.mxu0 }
  0xe5   : > { %v389_v28 = vadd.f32 %v388_v13, %v308_v15  ;;  %v405_v42 = vmax.f32 %v387_v35, 0.0 }
  0xe6   : > { %v390_v14 = vpop.f32.mrf.mxu0 }
  0xe7   : > { %v391_v30 = vadd.f32 %v390_v14, %v313_v20  ;;  %v406_v37 = vmax.f32 %v389_v28, 0.0 }
  0xe8   : > { %v392_v17 = vpop.f32.mrf.mxu0 }
  0xe9   : > { %v393_v23 = vadd.f32 %v392_v17, %v313_v20  ;;  %v407_v39 = vmax.f32 %v391_v30, 0.0  ;;  %v1278_v20 = vld [vmem:[%s1539_s2 + $0x10] sm:$0xff]  }
  0xea   : > { %v396_v18 = vpop.f32.mrf.mxu0 }
  0xeb   : > { %v397_v26 = vadd.f32 %v396_v18, %v318_v16  ;;  %v408_v32 = vmax.f32 %v393_v23, 0.0  ;;  %v417_v43 = vpack.c.bf16 %v407_v39, %v405_v42  ;;  %v534_v23 = vpop.permute.xlu1 %533 }
  0xec   : > { %v398_v19 = vpop.f32.mrf.mxu0 }
  0xed   : > { %v399_v24 = vadd.f32 %v398_v19, %v318_v16  ;;  %v409_v36 = vmax.f32 %v397_v26, 0.0  ;;  %v418_v41 = vpack.c.bf16 %v408_v32, %v406_v37 }
  0xee   : > { %v400_v22 = vpop.f32.mrf.mxu0 }
  0xef   : > { %v401_v25 = vadd.f32 %v400_v22, %v323_v21  ;;  %v410_v33 = vmax.f32 %v399_v24, 0.0  ;;  %v1323_v22 = vmov 3  }
  0xf0   : > { %v402_v27 = vpop.f32.mrf.mxu0  ;;  %1263 = vset.pattern.permute.xlu1 %v1323_v22  ;;  %1262 = vset.pattern.permute.xlu0 %v1323_v22 }
  0xf1   : > { %v403_v29 = vadd.f32 %v402_v27, %v323_v21  ;;  %v411_v31 = vmax.f32 %v401_v25, 0.0  ;;  %v1279_v21 = vld [vmem:[%s1539_s2 + $0x18] sm:$0xff]   ;;  %639 = vperm.xlu1 %1263, %v1426_v9   ;;  %635 = vperm.xlu0 %1262, %v1421_v8   ;;  %v526_v27 = vpop.permute.xlu1 %525 }
  0xf3   : > { %v412_v34 = vmax.f32 %v403_v29, 0.0  ;;  %v419_v40 = vpack.c.bf16 %v411_v31, %v409_v36  ;;  %v538_v31 = vpop.permute.xlu0 %537 }
  0xf5   : > { %v420_v38 = vpack.c.bf16 %v412_v34, %v410_v33  ;;  %627 = vperm.xlu1 %1263, %v1405_v3   ;;  %631 = vperm.xlu0 %1262, %v1410_v4   ;;  %v530_v32 = vpop.permute.xlu1 %529 }
  0xf7   : > { %466 = vmatprep.subr.bf16.mxu1 %v420_v38 }
  0xf8   : > { %467 = vmatpush1.bf16.msra.mxu1 %v419_v40 }
  0xf9   : > { %468 = vmatprep.subr.bf16.mxu1 %v418_v41 }
  0xfc   : > { %469 = vmatpush1.bf16.msra.mxu1 %v417_v43 }
  0xff   : > { %1180 = vmatmul.mubr.msk.bf16.vlgmr.msra.gmra.mxu1 %vm447_vm1, %v1276_v44 }
 0x100   : > { %496 = vmatprep.mubr.bf16.mxu1 %v1320_v2 }
 0x107   : > { %1181 = vmatmul.mubr.msk.bf16.gmra.mxu1 %vm447_vm1, %v1277_v45 }
 0x108   : > { %690 = vmatprep.mubr.bf16.mxu1 %v1320_v2 }
 0x1bf   : > { %v488_v47 = vpop.f32.mrf.mxu1 }
 0x1c0   : > { %v489_v11 = vadd.f32 %v488_v47, %v423_v60 }
 0x1c1   : > { %v490_v48 = vpop.f32.mrf.mxu1 }
 0x1c2   : > { %v491_v63 = vadd.f32 %v490_v48, %v423_v60  ;;  %v507_v18 = vmax.f32 %v489_v11, 0.0 }
 0x1c3   : > { %v492_v49 = vpop.f32.mrf.mxu1 }
 0x1c4   : > { %v493_v1 = vadd.f32 %v492_v49, %v427_v55  ;;  %v508_v13 = vmax.f32 %v491_v63, 0.0  ;;  %v640_v63 = vpop.permute.xlu1 %639 }
 0x1c5   : > { %v494_v51 = vpop.f32.mrf.mxu1 }
 0x1c6   : > { %v495_v57 = vadd.f32 %v494_v51, %v427_v55  ;;  %v509_v15 = vmax.f32 %v493_v1, 0.0  ;;  %v1280_v55 = vld [vmem:[%s1539_s2 + $0x20] sm:$0xff]  }
 0x1c7   : > { %v498_v53 = vpop.f32.mrf.mxu1 }
 0x1c8   : > { %v499_v61 = vadd.f32 %v498_v53, %v431_v50  ;;  %v510_v6 = vmax.f32 %v495_v57, 0.0  ;;  %v520_v19 = vpack.c.bf16 %v509_v15, %v507_v18  ;;  %v1324_v57 = vmov 4  }
 0x1c9   : > { %v500_v54 = vpop.f32.mrf.mxu1  ;;  %1264 = vset.pattern.permute.xlu1 %v1324_v57  ;;  %1265 = vset.pattern.permute.xlu0 %v1324_v57 }
 0x1ca   : > { %v501_v58 = vadd.f32 %v500_v54, %v431_v50  ;;  %v511_v12 = vmax.f32 %v499_v61, 0.0  ;;  %v521_v17 = vpack.c.bf16 %v510_v6, %v508_v13  ;;  %736 = vperm.xlu1 %1264, %v1421_v8   ;;  %740 = vperm.xlu0 %1265, %v1426_v9   ;;  %v636_v61 = vpop.permute.xlu0 %635 }
 0x1cb   : > { %v502_v56 = vpop.f32.mrf.mxu1 }
 0x1cc   : > { %v503_v59 = vadd.f32 %v502_v56, %v435_v52  ;;  %v512_v7 = vmax.f32 %v501_v58, 0.0  ;;  %v1281_v56 = vld [vmem:[%s1539_s2 + $0x28] sm:$0xff]  }
 0x1cd   : > { %v504_v62 = vpop.f32.mrf.mxu1 }
 0x1ce   : > { %v505_v0 = vadd.f32 %v504_v62, %v435_v52  ;;  %v513_v5 = vmax.f32 %v503_v59, 0.0  ;;  %728 = vperm.xlu1 %1264, %v1405_v3  }
 0x1d0   : > { %v514_v10 = vmax.f32 %v505_v0, 0.0  ;;  %v522_v16 = vpack.c.bf16 %v513_v5, %v511_v12  ;;  %v632_v5 = vpop.permute.xlu0 %631  ;;  %v628_v12 = vpop.permute.xlu1 %627 }
 0x1d2   : > { %v523_v14 = vpack.c.bf16 %v514_v10, %v512_v7  ;;  %732 = vperm.xlu1 %1264, %v1410_v4  }
 0x1d4   : > { %568 = vmatprep.subr.bf16.mxu0 %v523_v14 }
 0x1d5   : > { %569 = vmatpush1.bf16.msra.mxu0 %v522_v16 }
 0x1d6   : > { %570 = vmatprep.subr.bf16.mxu0 %v521_v17 }
 0x1d9   : > { %571 = vmatpush1.bf16.msra.mxu0 %v520_v19 }
 0x1dc   : > { %1188 = vmatmul.mubr.msk.bf16.vlgmr.msra.gmra.mxu0 %vm447_vm1, %v1278_v20 }
 0x1dd   : > { %598 = vmatprep.mubr.bf16.mxu0 %v1320_v2 }
 0x1e4   : > { %1189 = vmatmul.mubr.msk.bf16.gmra.mxu0 %vm447_vm1, %v1279_v21 }
 0x1e5   : > { %792 = vmatprep.mubr.bf16.mxu0 %v1320_v2 }
 0x29c   : > { %v590_v24 = vpop.f32.mrf.mxu0 }
 0x29d   : > { %v591_v46 = vadd.f32 %v590_v24, %v526_v27 }
 0x29e   : > { %v592_v25 = vpop.f32.mrf.mxu0 }
 0x29f   : > { %v593_v39 = vadd.f32 %v592_v25, %v526_v27  ;;  %v609_v53 = vmax.f32 %v591_v46, 0.0 }
 0x2a0   : > { %v594_v26 = vpop.f32.mrf.mxu0 }
 0x2a1   : > { %v595_v41 = vadd.f32 %v594_v26, %v530_v32  ;;  %v610_v48 = vmax.f32 %v593_v39, 0.0 }
 0x2a2   : > { %v596_v28 = vpop.f32.mrf.mxu0 }
 0x2a3   : > { %v597_v34 = vadd.f32 %v596_v28, %v530_v32  ;;  %v611_v50 = vmax.f32 %v595_v41, 0.0  ;;  %v1283_v32 = vld [vmem:[%s1540_s3 + $0x8] sm:$0xff]  }
 0x2a4   : > { %v600_v29 = vpop.f32.mrf.mxu0 }
 0x2a5   : > { %v601_v37 = vadd.f32 %v600_v29, %v534_v23  ;;  %v612_v43 = vmax.f32 %v597_v34, 0.0  ;;  %v622_v54 = vpack.c.bf16 %v611_v50, %v609_v53  ;;  %v737_v34 = vpop.permute.xlu1 %736 }
 0x2a6   : > { %v602_v30 = vpop.f32.mrf.mxu0 }
 0x2a7   : > { %v603_v35 = vadd.f32 %v602_v30, %v534_v23  ;;  %v613_v47 = vmax.f32 %v601_v37, 0.0  ;;  %v623_v52 = vpack.c.bf16 %v612_v43, %v610_v48 }
 0x2a8   : > { %v604_v33 = vpop.f32.mrf.mxu0 }
 0x2a9   : > { %v605_v36 = vadd.f32 %v604_v33, %v538_v31  ;;  %v614_v44 = vmax.f32 %v603_v35, 0.0  ;;  %v1325_v33 = vmov 5  }
 0x2aa   : > { %v606_v38 = vpop.f32.mrf.mxu0  ;;  %1267 = vset.pattern.permute.xlu1 %v1325_v33  ;;  %1266 = vset.pattern.permute.xlu0 %v1325_v33 }
 0x2ab   : > { %v607_v40 = vadd.f32 %v606_v38, %v538_v31  ;;  %v615_v42 = vmax.f32 %v605_v36, 0.0  ;;  %v1282_v31 = vld [vmem:[%s1540_s3] sm:$0xff]   ;;  %843 = vperm.xlu1 %1267, %v1426_v9   ;;  %839 = vperm.xlu0 %1266, %v1421_v8   ;;  %v729_v38 = vpop.permute.xlu1 %728 }
 0x2ad   : > { %v616_v45 = vmax.f32 %v607_v40, 0.0  ;;  %v624_v51 = vpack.c.bf16 %v615_v42, %v613_v47  ;;  %v741_v42 = vpop.permute.xlu0 %740 }
 0x2af   : > { %v625_v49 = vpack.c.bf16 %v616_v45, %v614_v44  ;;  %831 = vperm.xlu1 %1267, %v1405_v3   ;;  %835 = vperm.xlu0 %1266, %v1410_v4   ;;  %v733_v43 = vpop.permute.xlu1 %732 }
 0x2b1   : > { %670 = vmatprep.subr.bf16.mxu1 %v625_v49  ;;  %768 = vmatprep.subr.bf16.mxu0 %v625_v49 }
 0x2b2   : > { %671 = vmatpush1.bf16.msra.mxu1 %v624_v51  ;;  %769 = vmatpush1.bf16.msra.mxu0 %v624_v51 }
 0x2b3   : > { %672 = vmatprep.subr.bf16.mxu1 %v623_v52  ;;  %770 = vmatprep.subr.bf16.mxu0 %v623_v52 }
 0x2b6   : > { %673 = vmatpush1.bf16.msra.mxu1 %v622_v54  ;;  %771 = vmatpush1.bf16.msra.mxu0 %v622_v54 }
 0x2b9   : > { %1196 = vmatmul.mubr.msk.bf16.vlgmr.msra.gmra.mxu1 %vm447_vm1, %v1280_v55 }
 0x2ba   : > { %700 = vmatprep.mubr.bf16.mxu1 %v1320_v2 }
 0x2c1   : > { %1197 = vmatmul.mubr.msk.bf16.gmra.mxu1 %vm447_vm1, %v1281_v56 }
 0x2c2   : > { %894 = vmatprep.mubr.bf16.mxu1 %v1320_v2 }
 0x379   : > { %v692_v58 = vpop.f32.mrf.mxu1 }
 0x37a   : > { %v693_v22 = vadd.f32 %v692_v58, %v628_v12 }
 0x37b   : > { %v694_v59 = vpop.f32.mrf.mxu1 }
 0x37c   : > { %v695_v15 = vadd.f32 %v694_v59, %v628_v12  ;;  %v711_v29 = vmax.f32 %v693_v22, 0.0 }
 0x37d   : > { %v696_v60 = vpop.f32.mrf.mxu1 }
 0x37e   : > { %v697_v17 = vadd.f32 %v696_v60, %v632_v5  ;;  %v712_v24 = vmax.f32 %v695_v15, 0.0  ;;  %v844_v15 = vpop.permute.xlu1 %843 }
 0x37f   : > { %v698_v62 = vpop.f32.mrf.mxu1 }
 0x380   : > { %v699_v7 = vadd.f32 %v698_v62, %v632_v5  ;;  %v713_v26 = vmax.f32 %v697_v17, 0.0  ;;  %v1284_v5 = vld [vmem:[%s1539_s2 + $0x30] sm:$0xff]  }
 0x381   : > { %v702_v0 = vpop.f32.mrf.mxu1 }
 0x382   : > { %v703_v13 = vadd.f32 %v702_v0, %v636_v61  ;;  %v714_v19 = vmax.f32 %v699_v7, 0.0  ;;  %v723_v30 = vpack.c.bf16 %v713_v26, %v711_v29  ;;  %v1326_v7 = vmov 6  }
 0x383   : > { %v704_v1 = vpop.f32.mrf.mxu1  ;;  %1268 = vset.pattern.permute.xlu1 %v1326_v7  ;;  %1269 = vset.pattern.permute.xlu0 %v1326_v7 }
 0x384   : > { %v705_v10 = vadd.f32 %v704_v1, %v636_v61  ;;  %v715_v23 = vmax.f32 %v703_v13, 0.0  ;;  %v724_v28 = vpack.c.bf16 %v714_v19, %v712_v24  ;;  %941 = vperm.xlu1 %1268, %v1421_v8   ;;  %945 = vperm.xlu0 %1269, %v1426_v9   ;;  %v840_v13 = vpop.permute.xlu0 %839  ;;  %v832_v8 = vpop.permute.xlu1 %831 }
 0x385   : > { %v706_v6 = vpop.f32.mrf.mxu1 }
 0x386   : > { %v707_v11 = vadd.f32 %v706_v6, %v640_v63  ;;  %v716_v20 = vmax.f32 %v705_v10, 0.0  ;;  %v1285_v6 = vld [vmem:[%s1539_s2 + $0x38] sm:$0xff]  }
 0x387   : > { %v708_v14 = vpop.f32.mrf.mxu1 }
 0x388   : > { %v709_v16 = vadd.f32 %v708_v14, %v640_v63  ;;  %v717_v18 = vmax.f32 %v707_v11, 0.0  ;;  %933 = vperm.xlu1 %1268, %v1405_v3  }
 0x38a   : > { %v718_v21 = vmax.f32 %v709_v16, 0.0  ;;  %v725_v27 = vpack.c.bf16 %v717_v18, %v715_v23  ;;  %v836_v18 = vpop.permute.xlu0 %835 }
 0x38c   : > { %v726_v25 = vpack.c.bf16 %v718_v21, %v716_v20  ;;  %937 = vperm.xlu1 %1268, %v1410_v4  }
 0x38e   : > { %772 = vmatprep.subr.bf16.mxu0 %v726_v25 }
 0x38f   : > { %773 = vmatpush1.bf16.msra.mxu0 %v725_v27 }
 0x390   : > { %774 = vmatprep.subr.bf16.mxu0 %v724_v28 }
 0x393   : > { %775 = vmatpush1.bf16.msra.mxu0 %v723_v30 }
 0x396   : > { %1200 = vmatmul.mubr.msk.bf16.vlgmr.msra.gmra.mxu0 %vm753_vm2, %v1282_v31 }
 0x397   : > { %802 = vmatprep.mubr.bf16.mxu0 %v1320_v2 }
 0x39e   : > { %1201 = vmatmul.mubr.msk.bf16.gmra.mxu0 %vm753_vm2, %v1283_v32 }
 0x39f   : > { %996 = vmatprep.mubr.bf16.mxu0 %v1320_v2 }
 0x456   : > { %v794_v35 = vpop.f32.mrf.mxu0 }
 0x457   : > { %v795_v57 = vadd.f32 %v794_v35, %v729_v38 }
 0x458   : > { %v796_v36 = vpop.f32.mrf.mxu0 }
 0x459   : > { %v797_v50 = vadd.f32 %v796_v36, %v729_v38  ;;  %v813_v0 = vmax.f32 %v795_v57, 0.0 }
 0x45a   : > { %v798_v37 = vpop.f32.mrf.mxu0 }
 0x45b   : > { %v799_v52 = vadd.f32 %v798_v37, %v733_v43  ;;  %v814_v59 = vmax.f32 %v797_v50, 0.0  ;;  %v946_v50 = vpop.permute.xlu0 %945 }
 0x45c   : > { %v800_v39 = vpop.f32.mrf.mxu0 }
 0x45d   : > { %v801_v45 = vadd.f32 %v800_v39, %v733_v43  ;;  %v815_v61 = vmax.f32 %v799_v52, 0.0  ;;  %v1286_v39 = vld [vmem:[%s1539_s2 + $0x40] sm:$0xff]  }
 0x45e   : > { %v804_v40 = vpop.f32.mrf.mxu0 }
 0x45f   : > { %v805_v48 = vadd.f32 %v804_v40, %v737_v34  ;;  %v816_v54 = vmax.f32 %v801_v45, 0.0  ;;  %v826_v1 = vpack.c.bf16 %v815_v61, %v813_v0  ;;  %v1287_v40 = vld [vmem:[%s1539_s2 + $0x48] sm:$0xff]  }
 0x460   : > { %v806_v41 = vpop.f32.mrf.mxu0 }
 0x461   : > { %v807_v46 = vadd.f32 %v806_v41, %v737_v34  ;;  %v817_v58 = vmax.f32 %v805_v48, 0.0  ;;  %v827_v63 = vpack.c.bf16 %v816_v54, %v814_v59  ;;  %v1327_v41 = vmov 7  }
 0x462   : > { %v808_v44 = vpop.f32.mrf.mxu0  ;;  %1270 = vset.pattern.permute.xlu0 %v1327_v41 }
 0x463   : > { %v809_v47 = vadd.f32 %v808_v44, %v741_v42  ;;  %v818_v55 = vmax.f32 %v807_v46, 0.0  ;;  %1031 = vperm.xlu0 %1270, %v1405_v3  }
 0x464   : > { %v810_v49 = vpop.f32.mrf.mxu0 }
 0x465   : > { %v811_v51 = vadd.f32 %v810_v49, %v741_v42  ;;  %v819_v53 = vmax.f32 %v809_v47, 0.0  ;;  %v942_v42 = vpop.permute.xlu1 %941 }
 0x467   : > { %v820_v56 = vmax.f32 %v811_v51, 0.0  ;;  %v828_v62 = vpack.c.bf16 %v819_v53, %v817_v58 }
 0x469   : > { %v829_v60 = vpack.c.bf16 %v820_v56, %v818_v55  ;;  %v934_v46 = vpop.permute.xlu1 %933 }
 0x46b   : > { %874 = vmatprep.subr.bf16.mxu1 %v829_v60 }
 0x46c   : > { %875 = vmatpush1.bf16.msra.mxu1 %v828_v62 }
 0x46d   : > { %876 = vmatprep.subr.bf16.mxu1 %v827_v63 }
 0x470   : > { %877 = vmatpush1.bf16.msra.mxu1 %v826_v1 }
 0x473   : > { %1208 = vmatmul.mubr.msk.bf16.vlgmr.msra.gmra.mxu1 %vm447_vm1, %v1284_v5 }
 0x474   : > { %904 = vmatprep.mubr.bf16.mxu1 %v1320_v2 }
 0x47b   : > { %1209 = vmatmul.mubr.msk.bf16.gmra.mxu1 %vm447_vm1, %v1285_v6 }
 0x47c   : > { %1069 = vmatprep.mubr.bf16.mxu1 %v1320_v2 }
 0x533   : > { %v896_v10 = vpop.f32.mrf.mxu1 }
 0x534   : > { %v897_v30 = vadd.f32 %v896_v10, %v832_v8 }
 0x535   : > { %v898_v11 = vpop.f32.mrf.mxu1 }
 0x536   : > { %v899_v24 = vadd.f32 %v898_v11, %v832_v8  ;;  %v915_v37 = vmax.f32 %v897_v30, 0.0 }
 0x537   : > { %v900_v12 = vpop.f32.mrf.mxu1 }
 0x538   : > { %v901_v26 = vadd.f32 %v900_v12, %v836_v18  ;;  %v916_v32 = vmax.f32 %v899_v24, 0.0 }
 0x539   : > { %v902_v14 = vpop.f32.mrf.mxu1 }
 0x53a   : > { %v903_v20 = vadd.f32 %v902_v14, %v836_v18  ;;  %v917_v34 = vmax.f32 %v901_v26, 0.0  ;;  %v1032_v14 = vpop.permute.xlu0 %1031 }
 0x53b   : > { %v906_v16 = vpop.f32.mrf.mxu1 }
 0x53c   : > { %v907_v23 = vadd.f32 %v906_v16, %v840_v13  ;;  %v918_v27 = vmax.f32 %v903_v20, 0.0  ;;  %v928_v38 = vpack.c.bf16 %v917_v34, %v915_v37 }
 0x53d   : > { %v908_v17 = vpop.f32.mrf.mxu1 }
 0x53e   : > { %v909_v21 = vadd.f32 %v908_v17, %v840_v13  ;;  %v919_v31 = vmax.f32 %v907_v23, 0.0  ;;  %v929_v36 = vpack.c.bf16 %v918_v27, %v916_v32  ;;  %v1025_v13 = vld [vmem:[%s1541_s4] sm:$0xf] }
 0x53f   : > { %v910_v19 = vpop.f32.mrf.mxu1 }
 0x540   : > { %v911_v22 = vadd.f32 %v910_v19, %v844_v15  ;;  %v920_v28 = vmax.f32 %v909_v21, 0.0 }
 0x541   : > { %v912_v9 = vpop.f32.mrf.mxu1 }
 0x542   : > { %v913_v25 = vadd.f32 %v912_v9, %v844_v15  ;;  %v921_v4 = vmax.f32 %v911_v22, 0.0 }
 0x544   : > { %v922_v29 = vmax.f32 %v913_v25, 0.0  ;;  %v930_v35 = vpack.c.bf16 %v921_v4, %v919_v31  ;;  %v1078_v25 = vlaneseq }
 0x546   : > { %v931_v33 = vpack.c.bf16 %v922_v29, %v920_v28  ;;  %v1079_v26 = vshrl.u32 %v1078_v25, 7 }
 0x548   : > { %976 = vmatprep.subr.bf16.mxu0 %v931_v33  ;;  %vm1080_vm3 = vcmp.lt.s32.totalorder %v1079_v26, 3 }
 0x549   : > { %977 = vmatpush1.bf16.msra.mxu0 %v930_v35 }
 0x54a   : > { %978 = vmatprep.subr.bf16.mxu0 %v929_v36 }
 0x54d   : > { %979 = vmatpush1.bf16.msra.mxu0 %v928_v38 }
 0x550   : > { %1216 = vmatmul.mubr.msk.bf16.vlgmr.msra.gmra.mxu0 %vm447_vm1, %v1286_v39 }
 0x551   : > { %1006 = vmatprep.mubr.bf16.mxu0 %v1320_v2  ;;  %v938_v2 = vpop.permute.xlu1 %937 }
 0x558   : > { %1217 = vmatmul.mubr.msk.bf16.gmra.mxu0 %vm447_vm1, %v1287_v40 }
 0x610   : > { %v998_v43 = vpop.f32.mrf.mxu0 }
 0x611   : > { %v999_v63 = vadd.f32 %v998_v43, %v934_v46 }
 0x612   : > { %v1000_v44 = vpop.f32.mrf.mxu0 }
 0x613   : > { %v1001_v57 = vadd.f32 %v1000_v44, %v934_v46  ;;  %v1017_v11 = vmax.f32 %v999_v63, 0.0 }
 0x614   : > { %v1002_v45 = vpop.f32.mrf.mxu0 }
 0x615   : > { %v1003_v59 = vadd.f32 %v1002_v45, %v938_v2  ;;  %v1018_v1 = vmax.f32 %v1001_v57, 0.0 }
 0x616   : > { %v1004_v47 = vpop.f32.mrf.mxu0 }
 0x617   : > { %v1005_v52 = vadd.f32 %v1004_v47, %v938_v2  ;;  %v1019_v6 = vmax.f32 %v1003_v59, 0.0 }
 0x618   : > { %v1008_v48 = vpop.f32.mrf.mxu0 }
 0x619   : > { %v1009_v55 = vadd.f32 %v1008_v48, %v942_v42  ;;  %v1020_v60 = vmax.f32 %v1005_v52, 0.0  ;;  %v1026_v12 = vpack.c.bf16 %v1019_v6, %v1017_v11 }
 0x61a   : > { %v1010_v49 = vpop.f32.mrf.mxu0 }
 0x61b   : > { %v1011_v53 = vadd.f32 %v1010_v49, %v942_v42  ;;  %v1021_v0 = vmax.f32 %v1009_v55, 0.0  ;;  %v1027_v10 = vpack.c.bf16 %v1020_v60, %v1018_v1 }
 0x61c   : > { %v1012_v51 = vpop.f32.mrf.mxu0 }
 0x61d   : > { %v1013_v54 = vadd.f32 %v1012_v51, %v946_v50  ;;  %v1022_v61 = vmax.f32 %v1011_v53, 0.0 }
 0x61e   : > { %v1014_v56 = vpop.f32.mrf.mxu0 }
 0x61f   : > { %v1015_v58 = vadd.f32 %v1014_v56, %v946_v50  ;;  %v1023_v3 = vmax.f32 %v1013_v54, 0.0 }
 0x621   : > { %v1024_v62 = vmax.f32 %v1015_v58, 0.0  ;;  %v1028_v7 = vpack.c.bf16 %v1023_v3, %v1021_v0 }
 0x623   : > { %v1029_v5 = vpack.c.bf16 %v1024_v62, %v1022_v61 }
 0x625   : > { %1049 = vmatprep.subr.bf16.mxu1 %v1029_v5 }
 0x626   : > { %1050 = vmatpush1.bf16.msra.mxu1 %v1028_v7 }
 0x627   : > { %1051 = vmatprep.subr.bf16.mxu1 %v1027_v10 }
 0x62a   : > { %1052 = vmatpush1.bf16.msra.mxu1 %v1026_v12 }
 0x62d   : > { %1218 = vmatmul.mubr.msk.bf16.vlgmr.msra.gmra.mxu1 %vm447_vm1, %v1025_v13 }
 0x6ed   : > { %v1071_v15 = vpop.f32.mrf.mxu1 }
 0x6ee   : > { %v1072_v16 = vadd.f32 %v1071_v15, %v1032_v14 }
 0x6ef   : > { %v1073_v17 = vpop.f32.mrf.mxu1 }
 0x6f0   : > { %v1219_v18 = vmul.f32 -1.442695, %v1072_v16  ;;  %v1074_v19 = vadd.f32 %v1073_v17, %v1032_v14  ;;  %v1093_v4 = vmax.f32 %v1072_v16, 0.0 }
 0x6f1   : > { %v1075_v20 = vpop.f32.mrf.mxu1 }
 0x6f2   : > { %1288 = vpow2.f32 %v1219_v18  ;;  %v1220_v21 = vmul.f32 -1.442695, %v1074_v19  ;;  %v1094_v29 = vmax.f32 %v1074_v19, 0.0 }
 0x6f3   : > { %v1076_v22 = vpop.f32.mrf.mxu1 }
 0x6f4   : > { %1290 = vpow2.f32 %v1220_v21 }
 0x6ff   : > { %v1289_v8 = vpop.eup %1288 }
 0x700   : > { %v1087_v23 = vadd.f32 1.0, %v1289_v8 }
 0x701   : > { %v1291_v9 = vpop.eup %1290 }
 0x702   : > { %1292 = vrcp.f32 %v1087_v23  ;;  %v1088_v24 = vadd.f32 1.0, %v1291_v9 }
 0x704   : > { %1294 = vrcp.f32 %v1088_v24 }
 0x70f   : > { %v1293_v27 = vpop.eup %1292 }
 0x710   : > { %v1095_v28 = vsel %vm1080_vm3, %v1293_v27, %v1093_v4 }
 0x711   : > { %v1295_v30 = vpop.eup %1294  ;;  %1097 = vst [vmem:[%s292_s19] sm:$0xff] %v1095_v28 }
 0x712   : > { %v1096_v31 = vsel %vm1080_vm3, %v1295_v30, %v1094_v29 }
 0x713   : > { %1098 = vst [vmem:[%s292_s19 + $0x8] sm:$0xff] %v1096_v31 }
 0x714 PF: > { %p13_p9 = scmp.ge.s32.totalorder %s1380_s25, 6   ;;  %s1544_s21 = smov %s1314_s22 }
 0x715   : > { %s1545_s22 = smov %s1389_s28  ;;  %s1546_s23 = smov %s1380_s25 }
 0x716   :  { %15 = sbr.rel (!%p13_p9) target bundleno = 2 (0x2), region = 121 }

</bundles_post_ra>
